<compile_context>
chip_gen: v5e
topology: v5e:2x2
jax: 0.10.0
libtpu: 0.0.40
codegen_flags: <defaults>
</compile_context>

<pallas_src>
import functools

import jax
import jax.numpy as jnp
from jax.experimental import pallas as pl
from jax.experimental.pallas import tpu as pltpu


def _round_up(x, m):
    return ((x + m - 1) // m) * m


def _vmem_capacity_bytes():
    """Physical VMEM per core; conservative 64 MiB (v7x) if the query fails."""
    try:
        return int(pltpu.get_tpu_info().vmem_capacity_bytes)
    except Exception:
        return 64 * 1024 * 1024


def _budgets():
    cap = _vmem_capacity_bytes()
    if cap >= 96 * 1024 * 1024:          # v5e / v6e: 128 MiB physical VMEM
        return dict(vmem_limit=96 * 2**20, fused_budget=80 * 2**20,
                    tile_budget=64 * 2**20)
    # v7x: 64 MiB physical VMEM -> leave headroom below it.
    return dict(vmem_limit=48 * 2**20, fused_budget=28 * 2**20,
                tile_budget=26 * 2**20)


def _pick_tile_n(n_rows, hw, itemsize, tile_budget):
    """Rows per grid step for the tiled fallback.

    Per-step VMEM ~= double-buffered pred+gt input tiles (native dtype) plus
    ~5 live tile-sized f32 intermediates of the loss pass:
        (2 tensors * 2 buffers * itemsize + 5 * 4) * tile_n * hw  bytes.
    """
    sub = max(32 // itemsize, 8)          # sublane-packing multiple per dtype
    per_row = (4 * itemsize + 20) * hw
    t = max(tile_budget // per_row, sub)
    n_round = _round_up(n_rows, sub)
    if t >= n_round:
        return n_round                    # whole row axis in one tile
    return max((t // sub) * sub, sub)


# ----------------------------- kernel helpers ------------------------------


def _first_argmax(x, pos):
    """Index of the FIRST maximum along the last dim (torch.argmax tie-break)."""
    hw = x.shape[-1]
    rowmax = jnp.max(x, axis=-1, keepdims=True)
    cand = jnp.where(x == rowmax, pos, jnp.int32(hw))
    return jnp.min(cand, axis=-1, keepdims=True)            # (rows, 1)


def _log_softmax(x):
    m = jnp.max(x, axis=-1, keepdims=True)
    z = x - m
    lse = jnp.log(jnp.sum(jnp.exp(z), axis=-1, keepdims=True))
    return z - lse


def _kl_row_sums(pred, gt, mask):
    """Masked log-softmax + nn.KLDivLoss(reduction='none') row sums (f32)."""
    pm = pred.astype(jnp.float32) * mask
    gm = gt.astype(jnp.float32) * mask
    lp = _log_softmax(pm)    # KLDivLoss "input"  (log-probs of predictions)
    lg = _log_softmax(gm)    # KLDivLoss "target" (reference feeds log-probs)
    # elem = xlogy(target, target) - target*input; lg <= 0 everywhere, so
    # xlogy(lg, lg) is 0 where lg == 0 and NaN elsewhere -> identical values
    # to the reference, without spending an EUP log per element.
    xlogy_tt = jnp.where(lg == 0.0, jnp.float32(0.0), jnp.float32(jnp.nan))
    elem = xlogy_tt - lg * lp
    # TODO(synk): if bundle profiling ever shows XLU binding, do this row sum
    # as elem @ ones((HW, 1)) on the idle MXU instead of a lane reduction.
    return jnp.sum(elem, axis=-1, keepdims=True)             # (rows, 1)


# -------------------------------- kernels -----------------------------------


def _fused_kernel(pred_ref, gt_ref, loss_ref):
    """Single fused pass: pred/gt resident in VMEM; global mask + masked KL."""
    pred = pred_ref[...]        # native dtype: argmax compares are exact
    gt = gt_ref[...]
    n, hw = pred.shape
    pos = jax.lax.broadcasted_iota(jnp.int32, (n, hw), 1)
    idx_p = _first_argmax(pred, pos)
    idx_g = _first_argmax(gt, pos)
    hit = (pos == idx_p) | (pos == idx_g)                              # (n, hw)
    col_hit = jnp.max(jnp.where(hit, 1.0, 0.0), axis=0, keepdims=True)  # (1, hw)
    mask = 1.0 - col_hit        # 0 at the global union of argmax columns
    loss_ref[...] = _kl_row_sums(pred, gt, mask)


def _mask_tile_kernel(pred_ref, gt_ref, hit_ref, *, n_valid):
    """Per-tile partial column-hit row (1 where ANY valid row's argmax lands)."""
    i = pl.program_id(0)
    pred = pred_ref[...]        # native dtype (bf16 stays bf16 on v6e/v7x)
    gt = gt_ref[...]
    tn, hw = pred.shape
    pos = jax.lax.broadcasted_iota(jnp.int32, (tn, hw), 1)
    row = jax.lax.broadcasted_iota(jnp.int32, (tn, 1), 0) + i * tn
    valid = row < n_valid       # kills garbage pad rows of the last tile
    idx_p = _first_argmax(pred, pos)
    idx_g = _first_argmax(gt, pos)
    hit = ((pos == idx_p) | (pos == idx_g)) & valid
    tile_hit = jnp.max(jnp.where(hit, 1.0, 0.0), axis=0, keepdims=True)  # (1, hw)
    hit_ref[...] = tile_hit.reshape(1, 1, hw)


def _loss_tile_kernel(mask_ref, pred_ref, gt_ref, loss_ref):
    """Masked log-softmax + KL row sums for one row tile."""
    mask = mask_ref[...]        # (1, HW) f32, broadcasts over the row tile
    # Pad rows of the last tile compute garbage; the wrapper slices them off.
    loss_ref[...] = _kl_row_sums(pred_ref[...], gt_ref[...], mask)


# -------------------------------- wrapper -----------------------------------


def res_loss(output, target, target_weight=None, reduction='mean',
             *, force_tiled=False, tile_n=None):
    """Forward pass of ResLoss. output/target: (B, K, H, W); target_weight: (B, K)."""
    B, K, H, W = output.shape
    N, HW = B * K, H * W
    pred = output.reshape(N, HW)     # view as rows; no dtype cast, no copy
    gt = target.reshape(N, HW)
    itemsize = pred.dtype.itemsize
    bud = _budgets()

    cparams = pltpu.CompilerParams(
        dimension_semantics=("parallel",),
        vmem_limit_bytes=bud["vmem_limit"],
    )

    # Working-set estimate for the fully fused single pass (double-buffered
    # inputs + ~5 live full-size f32 intermediates).
    fused_est = (4 * itemsize + 20) * N * HW
    use_fused = (not force_tiled) and (fused_est <= bud["fused_budget"])

    if use_fused:
        per_row = pl.pallas_call(
            _fused_kernel,
            out_shape=jax.ShapeDtypeStruct((N, 1), jnp.float32),
            grid_spec=pl.GridSpec(
                grid=(1,),
                in_specs=[
                    pl.BlockSpec((N, HW), lambda i: (0, 0)),
                    pl.BlockSpec((N, HW), lambda i: (0, 0)),
                ],
                out_specs=pl.BlockSpec((N, 1), lambda i: (0, 0)),
            ),
            compiler_params=cparams,
        )(pred, gt)
        loss = per_row[:, 0].reshape(B, K)
    else:
        tn = tile_n if tile_n is not None else _pick_tile_n(
            N, HW, itemsize, bud["tile_budget"])
        num_tiles = pl.cdiv(N, tn)
        n_pad = num_tiles * tn

        # Pass 1: per-tile partial column hits ("parallel" -> megacore-safe on
        # v7x; no cross-tile accumulator RMW).  Combined into the global mask
        # outside the kernel (a tiny (num_tiles, HW) reduction in XLA).
        partial_hits = pl.pallas_call(
            functools.partial(_mask_tile_kernel, n_valid=N),
            out_shape=jax.ShapeDtypeStruct((num_tiles, 1, HW), jnp.float32),
            grid_spec=pl.GridSpec(
                grid=(num_tiles,),
                in_specs=[
                    pl.BlockSpec((tn, HW), lambda i: (i, 0)),
                    pl.BlockSpec((tn, HW), lambda i: (i, 0)),
                ],
                out_specs=pl.BlockSpec((1, 1, HW), lambda i: (i, 0, 0)),
            ),
            compiler_params=cparams,
        )(pred, gt)
        mask = (1.0 - jnp.max(partial_hits, axis=0)).astype(jnp.float32)  # (1, HW)

        # Pass 2: masked KL row sums, pipelined over row tiles ("parallel").
        per_row = pl.pallas_call(
            _loss_tile_kernel,
            out_shape=jax.ShapeDtypeStruct((n_pad, 1), jnp.float32),
            grid_spec=pl.GridSpec(
                grid=(num_tiles,),
                in_specs=[
                    pl.BlockSpec((1, HW), lambda i: (0, 0)),      # broadcast mask
                    pl.BlockSpec((tn, HW), lambda i: (i, 0)),
                    pl.BlockSpec((tn, HW), lambda i: (i, 0)),
                ],
                # (tn, 1) store is lane-sparse, but total volume is only 4*N
                # bytes -> low priority per review; keep simple.
                out_specs=pl.BlockSpec((tn, 1), lambda i: (i, 0)),
            ),
            compiler_params=cparams,
        )(mask, pred, gt)
        loss = per_row[:N, 0].reshape(B, K)

    if target_weight is not None:
        loss = loss * target_weight.reshape(B, K)
    if reduction == 'mean':
        return jnp.mean(loss)
    elif reduction == 'none':
        # Reference 'none' branch returns loss.mean(dim=-1) -> shape (B,).
        return jnp.mean(loss, axis=-1)
    else:
        raise ValueError(f"unsupported reduction: {reduction}")


if __name__ == "__main__":
    key = jax.random.PRNGKey(0)
    k1, k2, k3, k4 = jax.random.split(key, 4)

    # Small shapes consistent with the module: (B, K, H, W) heatmaps.
    B, K, H, W = 2, 4, 16, 16
    output = jax.random.normal(k1, (B, K, H, W), dtype=jnp.float32)
    target = jax.nn.softmax(
        jax.random.normal(k2, (B, K, H * W), dtype=jnp.float32), axis=-1
    ).reshape(B, K, H, W)
    target_weight = jnp.ones((B, K), dtype=jnp.float32)

    # Default path (fused fast path at this size).
    loss_mean = res_loss(output, target, target_weight, reduction='mean')
    loss_none = res_loss(output, target, target_weight, reduction='none')
    jax.block_until_ready(loss_mean)
    jax.block_until_ready(loss_none)
    assert loss_mean.shape == ()
    assert loss_none.shape == (B,)
    # The reference loss is NaN by construction (it feeds log-probabilities as
    # the KLDivLoss target); faithful reproduction.
    assert bool(jnp.isnan(loss_mean))

    # Also exercise the tiled fallback (forced) with more than one row tile.
    B2, K2 = 4, 4
    out2 = jax.random.normal(k3, (B2, K2, H, W), dtype=jnp.float32)
    tgt2 = jax.random.normal(k4, (B2, K2, H, W), dtype=jnp.float32)
    loss_tiled = res_loss(out2, tgt2, None, reduction='none',
                          force_tiled=True, tile_n=8)
    jax.block_until_ready(loss_tiled)
    assert loss_tiled.shape == (B2,)

    print("KERNEL_OK")
</pallas_src>

<mosaic_0001>
module attributes {stable_mosaic.version = 11 : i64} {
  func.func @_fused_kernel(%arg0: i32, %arg1: memref<8x256xf32, #tpu.memory_space<vmem>>, %arg2: memref<8x256xf32, #tpu.memory_space<vmem>>, %arg3: memref<8x1xf32, #tpu.memory_space<vmem>>) attributes {dimension_semantics = [#tpu.dimension_semantics<parallel>], iteration_bounds = array<i64: 1>, scalar_prefetch = 0 : i64, scratch_operands = 0 : i64, tpu.core_type = #tpu.core_type<tc>, window_params = [{pipeline_mode = #tpu.pipeline_mode<synchronous>, transform_indices = @transform_0, window_bounds = array<i64: 8, 256>}, {pipeline_mode = #tpu.pipeline_mode<synchronous>, transform_indices = @transform_1, window_bounds = array<i64: 8, 256>}, {pipeline_mode = #tpu.pipeline_mode<synchronous>, transform_indices = @transform_2, window_bounds = array<i64: 8, 1>}]} {
    %c0 = arith.constant 0 : index
    %c0_0 = arith.constant 0 : index
    %0 = vector.load %arg1[%c0, %c0_0] : memref<8x256xf32, #tpu.memory_space<vmem>>, vector<8x256xf32>
    %c0_1 = arith.constant 0 : index
    %c0_2 = arith.constant 0 : index
    %1 = vector.load %arg2[%c0_1, %c0_2] : memref<8x256xf32, #tpu.memory_space<vmem>>, vector<8x256xf32>
    %2 = tpu.iota {dimensions = array<i32: 1>} : vector<8x256xi32>
    %cst = arith.constant dense<0xFF800000> : vector<8xf32>
    %3 = vector.multi_reduction <maximumf>, %0, %cst [1] : vector<8x256xf32> to vector<8xf32>
    %4 = vector.shape_cast %3 : vector<8xf32> to vector<8x1xf32>
    %5 = vector.broadcast %4 : vector<8x1xf32> to vector<8x256xf32>
    %6 = arith.cmpf oeq, %0, %5 : vector<8x256xf32>
    %c256_i32 = arith.constant 256 : i32
    %7 = vector.broadcast %c256_i32 : i32 to vector<8x256xi32>
    %8 = arith.select %6, %2, %7 : vector<8x256xi1>, vector<8x256xi32>
    %cst_3 = arith.constant dense<2147483647> : vector<8xi32>
    %9 = vector.multi_reduction <minsi>, %8, %cst_3 [1] : vector<8x256xi32> to vector<8xi32>
    %10 = vector.shape_cast %9 : vector<8xi32> to vector<8x1xi32>
    %cst_4 = arith.constant dense<0xFF800000> : vector<8xf32>
    %11 = vector.multi_reduction <maximumf>, %1, %cst_4 [1] : vector<8x256xf32> to vector<8xf32>
    %12 = vector.shape_cast %11 : vector<8xf32> to vector<8x1xf32>
    %13 = vector.broadcast %12 : vector<8x1xf32> to vector<8x256xf32>
    %14 = arith.cmpf oeq, %1, %13 : vector<8x256xf32>
    %c256_i32_5 = arith.constant 256 : i32
    %15 = vector.broadcast %c256_i32_5 : i32 to vector<8x256xi32>
    %16 = arith.select %14, %2, %15 : vector<8x256xi1>, vector<8x256xi32>
    %cst_6 = arith.constant dense<2147483647> : vector<8xi32>
    %17 = vector.multi_reduction <minsi>, %16, %cst_6 [1] : vector<8x256xi32> to vector<8xi32>
    %18 = vector.shape_cast %17 : vector<8xi32> to vector<8x1xi32>
    %19 = vector.broadcast %10 : vector<8x1xi32> to vector<8x256xi32>
    %20 = arith.cmpi eq, %2, %19 : vector<8x256xi32>
    %21 = vector.broadcast %18 : vector<8x1xi32> to vector<8x256xi32>
    %22 = arith.cmpi eq, %2, %21 : vector<8x256xi32>
    %23 = arith.ori %20, %22 : vector<8x256xi1>
    %cst_7 = arith.constant 1.000000e+00 : f32
    %cst_8 = arith.constant 0.000000e+00 : f32
    %24 = vector.broadcast %cst_7 : f32 to vector<8x256xf32>
    %25 = vector.broadcast %cst_8 : f32 to vector<8x256xf32>
    %26 = arith.select %23, %24, %25 : vector<8x256xi1>, vector<8x256xf32>
    %cst_9 = arith.constant dense<0xFF800000> : vector<256xf32>
    %27 = vector.multi_reduction <maximumf>, %26, %cst_9 [0] : vector<8x256xf32> to vector<256xf32>
    %28 = vector.shape_cast %27 : vector<256xf32> to vector<1x256xf32>
    %cst_10 = arith.constant 1.000000e+00 : f32
    %29 = vector.broadcast %cst_10 : f32 to vector<1x256xf32>
    %30 = arith.subf %29, %28 : vector<1x256xf32>
    %31 = vector.broadcast %30 : vector<1x256xf32> to vector<8x256xf32>
    %32 = arith.mulf %0, %31 : vector<8x256xf32>
    %33 = vector.broadcast %30 : vector<1x256xf32> to vector<8x256xf32>
    %34 = arith.mulf %1, %33 : vector<8x256xf32>
    %cst_11 = arith.constant dense<0xFF800000> : vector<8xf32>
    %35 = vector.multi_reduction <maximumf>, %32, %cst_11 [1] : vector<8x256xf32> to vector<8xf32>
    %36 = vector.shape_cast %35 : vector<8xf32> to vector<8x1xf32>
    %37 = vector.broadcast %36 : vector<8x1xf32> to vector<8x256xf32>
    %38 = arith.subf %32, %37 : vector<8x256xf32>
    %39 = math.exp %38 : vector<8x256xf32>
    %cst_12 = arith.constant dense<0.000000e+00> : vector<8xf32>
    %40 = vector.multi_reduction <add>, %39, %cst_12 [1] : vector<8x256xf32> to vector<8xf32>
    %41 = vector.shape_cast %40 : vector<8xf32> to vector<8x1xf32>
    %42 = math.log %41 : vector<8x1xf32>
    %43 = vector.broadcast %42 : vector<8x1xf32> to vector<8x256xf32>
    %44 = arith.subf %38, %43 : vector<8x256xf32>
    %cst_13 = arith.constant dense<0xFF800000> : vector<8xf32>
    %45 = vector.multi_reduction <maximumf>, %34, %cst_13 [1] : vector<8x256xf32> to vector<8xf32>
    %46 = vector.shape_cast %45 : vector<8xf32> to vector<8x1xf32>
    %47 = vector.broadcast %46 : vector<8x1xf32> to vector<8x256xf32>
    %48 = arith.subf %34, %47 : vector<8x256xf32>
    %49 = math.exp %48 : vector<8x256xf32>
    %cst_14 = arith.constant dense<0.000000e+00> : vector<8xf32>
    %50 = vector.multi_reduction <add>, %49, %cst_14 [1] : vector<8x256xf32> to vector<8xf32>
    %51 = vector.shape_cast %50 : vector<8xf32> to vector<8x1xf32>
    %52 = math.log %51 : vector<8x1xf32>
    %53 = vector.broadcast %52 : vector<8x1xf32> to vector<8x256xf32>
    %54 = arith.subf %48, %53 : vector<8x256xf32>
    %cst_15 = arith.constant 0.000000e+00 : f32
    %55 = vector.broadcast %cst_15 : f32 to vector<8x256xf32>
    %56 = arith.cmpf oeq, %54, %55 : vector<8x256xf32>
    %cst_16 = arith.constant 0.000000e+00 : f32
    %cst_17 = arith.constant 0x7FC00000 : f32
    %57 = vector.broadcast %cst_16 : f32 to vector<8x256xf32>
    %58 = vector.broadcast %cst_17 : f32 to vector<8x256xf32>
    %59 = arith.select %56, %57, %58 : vector<8x256xi1>, vector<8x256xf32>
    %60 = arith.mulf %54, %44 : vector<8x256xf32>
    %61 = arith.subf %59, %60 : vector<8x256xf32>
    %cst_18 = arith.constant dense<0.000000e+00> : vector<8xf32>
    %62 = vector.multi_reduction <add>, %61, %cst_18 [1] : vector<8x256xf32> to vector<8xf32>
    %63 = vector.shape_cast %62 : vector<8xf32> to vector<8x1xf32>
    %c0_19 = arith.constant 0 : index
    %c0_20 = arith.constant 0 : index
    %64 = vector.load %arg3[%c0_19, %c0_20] : memref<8x1xf32, #tpu.memory_space<vmem>>, vector<8x1xf32>
    tpu.vector_store %arg3[%c0_19, %c0_20], %63 {strides = array<i32>} : memref<8x1xf32, #tpu.memory_space<vmem>>, vector<8x1xf32>,
    return
  }
  func.func @transform_0(%arg0: i32) -> (i32, i32) {
    %c0_i32 = arith.constant 0 : i32
    %c0_i32_0 = arith.constant 0 : i32
    %c0_i32_1 = arith.constant 0 : i32
    return %c0_i32, %c0_i32_0 : i32, i32
  }
  func.func @transform_1(%arg0: i32) -> (i32, i32) {
    %c0_i32 = arith.constant 0 : i32
    %c0_i32_0 = arith.constant 0 : i32
    %c0_i32_1 = arith.constant 0 : i32
    return %c0_i32, %c0_i32_0 : i32, i32
  }
  func.func @transform_2(%arg0: i32) -> (i32, i32) {
    %c0_i32 = arith.constant 0 : i32
    %c0_i32_0 = arith.constant 0 : i32
    %c0_i32_1 = arith.constant 0 : i32
    return %c0_i32, %c0_i32_0 : i32, i32
  }
}

</mosaic_0001>

<bundles_post_ra>
// kernel: tpu_custom_call.1
= control target key start
LH: loop header
LB: loop body
LE: loop exit
PB: predicated region body
PF: predicated region fallthrough
CT: control target
= control target key end

     0   :  { %7 = vsyncpa [#allocation3], 0  ;;  %s285_s0 = inlined_call_operand.hbm [shape: f32[8,256], index: 0, kind: input, shape index: {}]   ;;  %s286_s1 = inlined_call_operand.hbm [shape: f32[8,256], index: 1, kind: input, shape index: {}]   ;;  %s287_s2 = inlined_call_operand.vmem [shape: f32[8,1], index: 2, kind: output, shape index: {}]  }
   0x1   :  { %s14_s11 = sshll.u32 %s285_s0, 4  ;;  %s15_s11 = int_to_ptr.hbm [resolvable:$true] %s14_s11 }
   0x2   :  { %8 = vsyncpa [#allocation5], 0  ;;  %s237_s12 = smov [#allocation2]   ;;  %s25_s16 = sshll.u32 %s286_s1, 4  ;;  %s26_s16 = int_to_ptr.hbm [resolvable:$true] %s25_s16 }
   0x3   :  { %s16_s13 = sshll.u32 %s237_s12, 4  ;;  %s238_s17 = smov [#allocation4]   ;;  %s17_s13 = int_to_ptr.vmem [resolvable:$true] %s16_s13 }
   0x4   :  { %19 = dma.hbm_to_vmem [thread:$0]  %s15_s11, 256, %s17_s13, [#allocation3]  }
   0x5   :  { %s27_s18 = sshll.u32 %s238_s17, 4  ;;  %s28_s18 = int_to_ptr.vmem [resolvable:$true] %s27_s18 }
   0x6   :  { %30 = dma.hbm_to_vmem [thread:$0]  %s26_s16, 256, %s28_s18, [#allocation5]  }
   0x7   :  { %233 = dma.done.wait [#allocation3], 256  }
   0x8   :  { %234 = vsyncadd [#allocation3], 4294967040 }
   0x9   :  { %235 = dma.done.wait [#allocation5], 256  }
   0xa   :  { %236 = vsyncadd [#allocation5], 4294967040  ;;  %v262_v0 = vld [vmem:[#allocation2] sm:$0xff]  ;;  %v264_v1 = vld [vmem:[#allocation2 + $0x8] sm:$0xff]  ;;  %v43_v6 = vlaneseq  ;;  %v239_v39 = vmov 0.0  }
   0xb   :  { %v46_v2 = vmax.f32 %v262_v0, %v264_v1  ;;  %v268_v3 = vld [vmem:[#allocation4] sm:$0xff]  ;;  %v270_v4 = vld [vmem:[#allocation4 + $0x8] sm:$0xff] }
   0xc   :  { %v69_v5 = vmax.f32 %v268_v3, %v270_v4  ;;  %v44_v7 = vand.u32 127, %v43_v6 }
   0xd   :  { %47 = vmax.xlane.f32.xlu0 %v46_v2 }
   0xe   :  { %v45_v8 = vadd.s32 128, %v44_v7 }
  0x15   :  { %70 = vmax.xlane.f32.xlu0 %v69_v5 }
  0x80   :  { %v48_v9 = vpop.xlane.xlu0 %47 }
  0x81   :  { %vm49_vm0 = vcmp.eq.f32.partialorder %v262_v0, %v48_v9  ;;  %vm50_vm1 = vcmp.eq.f32.partialorder %v264_v1, %v48_v9 }
  0x82   :  { %v51_v10 = vsel %vm49_vm0, %v44_v7, 256  ;;  %v52_v11 = vsel %vm50_vm1, %v45_v8, 256  ;;  %vm161_vm0 = vcmask 7168  }
  0x83   :  { %vm53_vm2 = vcmp.lt.s32.totalorder %v51_v10, %v52_v11 }
  0x84   :  { %v54_v12 = vsel %vm53_vm2, %v51_v10, %v52_v11 }
  0x85   :  { %v56_v13 = vshra.s32 %v54_v12, 16  ;;  %v55_v21 = vand.u32 65535, %v54_v12 }
  0x87   :  { %v58_v14 = vcvt.s32.f32 %v56_v13  ;;  %v57_v23 = vcvt.s32.f32 %v55_v21 }
  0x88   :  { %v71_v15 = vpop.xlane.xlu0 %70 }
  0x89   :  { %vm72_vm3 = vcmp.eq.f32.partialorder %v268_v3, %v71_v15  ;;  %vm73_vm4 = vcmp.eq.f32.partialorder %v270_v4, %v71_v15  ;;  %59 = vmin.xlane.f32.xlu1 %v58_v14 }
  0x8a   :  { %v74_v16 = vsel %vm72_vm3, %v44_v7, 256  ;;  %v75_v17 = vsel %vm73_vm4, %v45_v8, 256 }
  0x8b   :  { %vm76_vm5 = vcmp.lt.s32.totalorder %v74_v16, %v75_v17 }
  0x8c   :  { %v77_v18 = vsel %vm76_vm5, %v74_v16, %v75_v17 }
  0x8d   :  { %v79_v19 = vshra.s32 %v77_v18, 16  ;;  %v78_v25 = vand.u32 65535, %v77_v18 }
  0x8f   :  { %v81_v20 = vcvt.s32.f32 %v79_v19  ;;  %v80_v27 = vcvt.s32.f32 %v78_v25 }
  0x91   :  { %82 = vmin.xlane.f32.xlu1 %v81_v20 }
  0xfc   :  { %v60_v22 = vpop.xlane.xlu1 %59 }
  0xfd   :  { %vm61_vm6 = vcmp.eq.f32.partialorder %v58_v14, %v60_v22  ;;  %v66_v30 = vcvt.f32.s32 %v60_v22 }
  0xfe   :  { %v62_v24 = vsel %vm61_vm6, %v57_v23, inf }
  0xff   :  { %63 = vmin.xlane.f32.xlu2 %v62_v24  ;;  %v67_v33 = vshll.u32 %v66_v30, 16  ;;  %v240_v24 = vmov nan  }
 0x104   :  { %v83_v26 = vpop.xlane.xlu1 %82 }
 0x105   :  { %vm84_vm7 = vcmp.eq.f32.partialorder %v81_v20, %v83_v26  ;;  %v89_v31 = vcvt.f32.s32 %v83_v26 }
 0x106   :  { %v85_v28 = vsel %vm84_vm7, %v80_v27, inf }
 0x107   :  { %86 = vmin.xlane.f32.xlu2 %v85_v28  ;;  %v90_v35 = vshll.u32 %v89_v31, 16 }
 0x172   :  { %v64_v29 = vpop.xlane.xlu2 %63 }
 0x173   :  { %v65_v32 = vcvt.f32.s32 %v64_v29 }
 0x175   :  { %v68_v36 = vadd.s32 %v67_v33, %v65_v32 }
 0x177   :  { %vm92_vm8 = vcmp.eq.s32.totalorder %v44_v7, %v68_v36  ;;  %vm93_vm11 = vcmp.eq.s32.totalorder %v45_v8, %v68_v36 }
 0x17a   :  { %v87_v34 = vpop.xlane.xlu2 %86 }
 0x17b   :  { %v88_v37 = vcvt.f32.s32 %v87_v34 }
 0x17d   :  { %v91_v38 = vadd.s32 %v90_v35, %v88_v37 }
 0x17f   :  { %vm94_vm9 = vcmp.eq.s32.totalorder %v44_v7, %v91_v38  ;;  %vm95_vm10 = vcmp.eq.s32.totalorder %v45_v8, %v91_v38 }
 0x180   :  { %vm96_vm12 = vmor %vm92_vm8, %vm94_vm9 }
 0x181   :  { %vm97_vm13 = vmor %vm93_vm11, %vm95_vm10  ;;  %v98_v40 = vsel %vm96_vm12, 1.0, %v239_v39 }
 0x182   :  { %v99_v41 = vsel %vm97_vm13, 1.0, %v239_v39  ;;  %v100_v42 = vrot.slane %v98_v40, 4 }
 0x183   :  { %v106_v43 = vrot.slane %v99_v41, 4 }
 0x184   :  { %v101_v44 = vmax.f32 %v98_v40, %v100_v42 }
 0x185   :  { %v107_v45 = vmax.f32 %v99_v41, %v106_v43 }
 0x186   :  { %v102_v46 = vrot.slane %v101_v44, 2 }
 0x187   :  { %v108_v47 = vrot.slane %v107_v45, 2 }
 0x188   :  { %v103_v48 = vmax.f32 %v101_v44, %v102_v46 }
 0x189   :  { %v109_v49 = vmax.f32 %v107_v45, %v108_v47 }
 0x18a   :  { %v104_v50 = vrot.slane %v103_v48, 1 }
 0x18b   :  { %v110_v51 = vrot.slane %v109_v49, 1 }
 0x18c   :  { %v105_v52 = vmax.f32 %v103_v48, %v104_v50 }
 0x18d   :  { %v111_v53 = vmax.f32 %v109_v49, %v110_v51 }
 0x18e   :  { %v112_v54 = vsub.f32 1.0, %v105_v52 }
 0x18f   :  { %v113_v55 = vsub.f32 1.0, %v111_v53 }
 0x190   :  { %v116_v56 = vmul.f32 %v112_v54, %v268_v3  ;;  %v114_v57 = vmul.f32 %v112_v54, %v262_v0 }
 0x191   :  { %v117_v58 = vmul.f32 %v113_v55, %v270_v4  ;;  %v115_v59 = vmul.f32 %v113_v55, %v264_v1 }
 0x193   :  { %v134_v60 = vmax.f32 %v116_v56, %v117_v58  ;;  %v118_v61 = vmax.f32 %v114_v57, %v115_v59 }
 0x195   :  { %135 = vmax.xlane.f32.xlu1 %v134_v60  ;;  %119 = vmax.xlane.f32.xlu0 %v118_v61 }
 0x208   :  { %v136_v62 = vpop.xlane.xlu1 %135  ;;  %v120_v63 = vpop.xlane.xlu0 %119 }
 0x209   :  { %v137_v2 = vsub.f32 %v116_v56, %v136_v62  ;;  %v138_v5 = vsub.f32 %v117_v58, %v136_v62  ;;  %v121_v6 = vsub.f32 %v114_v57, %v120_v63  ;;  %v122_v7 = vsub.f32 %v115_v59, %v120_v63 }
 0x20b   :  { %v139_v8 = vmul.f32 1.442695, %v137_v2  ;;  %v141_v9 = vmul.f32 1.442695, %v138_v5  ;;  %v123_v10 = vmul.f32 1.442695, %v121_v6 }
 0x20c   :  { %v125_v3 = vmul.f32 1.442695, %v122_v7 }
 0x20d   :  { %173 = vpow2.f32 %v139_v8 }
 0x20e   :  { %175 = vpow2.f32 %v141_v9 }
 0x20f   :  { %177 = vpow2.f32 %v123_v10 }
 0x210   :  { %179 = vpow2.f32 %v125_v3 }
 0x213   :  { %v174_v0 = vpop.eup %173 }
 0x214   :  { %v176_v1 = vpop.eup %175 }
 0x215   :  { %v178_v4 = vpop.eup %177  ;;  %v143_v11 = vadd.f32 %v176_v1, %v174_v0 }
 0x216   :  { %v180_v12 = vpop.eup %179 }
 0x217   :  { %144 = vadd.xlane.f32.xlu0 %v143_v11  ;;  %v127_v13 = vadd.f32 %v180_v12, %v178_v4 }
 0x219   :  { %128 = vadd.xlane.f32.xlu2 %v127_v13 }
 0x28a   :  { %v145_v14 = vpop.xlane.xlu0 %144 }
 0x28b   :  { %181 = vlog2.f32 %v145_v14 }
 0x28c   :  { %v129_v15 = vpop.xlane.xlu2 %128 }
 0x28d   :  { %183 = vlog2.f32 %v129_v15 }
 0x291   :  { %v182_v16 = vpop.eup %181 }
 0x292   :  { %v147_v17 = vmul.f32 0.6931472, %v182_v16 }
 0x293   :  { %v184_v18 = vpop.eup %183 }
 0x294   :  { %v131_v19 = vmul.f32 0.6931472, %v184_v18  ;;  %v148_v20 = vsub.f32 %v137_v2, %v147_v17  ;;  %v149_v21 = vsub.f32 %v138_v5, %v147_v17 }
 0x296   :  { %v132_v22 = vsub.f32 %v121_v6, %v131_v19  ;;  %v133_v23 = vsub.f32 %v122_v7, %v131_v19  ;;  %vm150_vm14 = vcmp.eq.f32.partialorder %v148_v20, 0.0  ;;  %vm151_vm15 = vcmp.eq.f32.partialorder %v149_v21, 0.0 }
 0x297   :  { %v152_v25 = vsel %vm150_vm14, 0.0, %v240_v24  ;;  %v153_v26 = vsel %vm151_vm15, 0.0, %v240_v24 }
 0x298   :  { %v154_v27 = vmul.f32 %v148_v20, %v132_v22  ;;  %v155_v28 = vmul.f32 %v149_v21, %v133_v23 }
 0x29a   :  { %v156_v29 = vsub.f32 %v152_v25, %v154_v27  ;;  %v157_v30 = vsub.f32 %v153_v26, %v155_v28 }
 0x29c   :  { %v158_v31 = vadd.f32 %v157_v30, %v156_v29 }
 0x29e   :  { %159 = vadd.xlane.f32.xlu1 %v158_v31 }
 0x311   :  { %v160_v32 = vpop.xlane.xlu1 %159 }
 0x312   :  { %162 = vst.msk [vmem:[%s287_s2] sm:$0xff] %vm161_vm0, %v160_v32 }
 0x313   :  { %167 = vsyncpa [#allocation3], 1 }
 0x314   :  { %168 = vsyncpa [#allocation5], 1 }

</bundles_post_ra>
